<compile_context>
chip_gen: v7x
topology: tpu7x:2x2x1
jax: 0.10.0
libtpu: 0.0.40
codegen_flags: <defaults>
</compile_context>

<pallas_src>
import math

import jax
import jax.numpy as jnp
from jax.experimental import pallas as pl
from jax.experimental.pallas import tpu as pltpu

_LANE = 128
_BIG_NEG = -1e30  # behaves like -inf through max+tanh, avoids inf/nan arithmetic


def pcnn_kernel(x_ref, mask_ref, p1_ref, p2_ref, p3_ref, w_ref, b_ref, out_ref):
    # x_ref:    (TB, L, D)   float32
    # mask_ref: (TB, L, 1)   float32 (0/1 sequence mask)
    # p*_ref:   (TB, L, 1)   float32 (0/1 piece membership)
    # w_ref:    (3D, Fp)     bf16 or f32: taps stacked [x[l-1] | x[l] | x[l+1]]
    # b_ref:    (1, Fp)      float32 conv bias (zero-padded)
    # out_ref:  (TB, 3*Fp)   float32 — pieces at lane offsets 0, Fp, 2*Fp
    x = x_ref[...] * mask_ref[...]                      # f32 elementwise (input * mask)
    TB, L, D = x.shape
    Fp = w_ref.shape[-1]

    # Conv1d(kernel=3, padding=1) as ONE matmul: concat the shifted inputs on the
    # contraction axis -> (TB*L, 3D) @ (3D, Fp).
    zrow = jnp.zeros((TB, 1, D), x.dtype)
    x_prev = jnp.concatenate([zrow, x[:, :-1, :]], axis=1)   # x at position l-1
    x_next = jnp.concatenate([x[:, 1:, :], zrow], axis=1)    # x at position l+1
    x_cat = jnp.concatenate([x_prev, x, x_next], axis=-1)    # (TB, L, 3D)

    lhs = x_cat.reshape(TB * L, 3 * D).astype(w_ref.dtype)   # bf16 (or f32) MXU operand
    conv = jnp.dot(lhs, w_ref[...], preferred_element_type=jnp.float32)
    conv = conv.reshape(TB, L, Fp) + b_ref[...][None, :, :]  # f32, bias hoisted

    def piece(pm_ref):
        # Additive -1e30 on excluded positions (matches masked_fill_(-inf) through
        # the max+tanh); keeps only one (TB, L, Fp) temp live at a time.
        neg = (jnp.float32(1.0) - pm_ref[...]) * jnp.float32(_BIG_NEG)   # (TB, L, 1)
        return jnp.tanh(jnp.max(conv + neg, axis=1))                     # (TB, Fp)

    # Lane-dense stores at 128-aligned static offsets (no concat, no masked vst).
    out_ref[:, 0:Fp] = piece(p1_ref)
    out_ref[:, Fp:2 * Fp] = piece(p2_ref)
    out_ref[:, 2 * Fp:3 * Fp] = piece(p3_ref)


def prepare_pcnn_params(weight, bias, *, use_bf16=True):
    """Precompute the weight slab once (outside the per-call path).

    weight: (F, D, 3) torch Conv1d layout; bias: (F,).
    Returns (w_slab (3D, Fp), bias_pad (1, Fp), F).
    """
    F_, D, K = weight.shape
    assert K == 3, "PCNN uses a kernel-size-3 conv"
    # w_slab[k*D + d, f] = weight[f, d, k]; tap k=0 -> x[l-1], k=1 -> x[l], k=2 -> x[l+1]
    w = jnp.transpose(weight, (2, 1, 0)).reshape(K * D, F_).astype(jnp.float32)
    Fp = max(_LANE, ((F_ + _LANE - 1) // _LANE) * _LANE)
    w_pad = jnp.zeros((K * D, Fp), jnp.float32).at[:, :F_].set(w)
    if use_bf16:
        w_pad = w_pad.astype(jnp.bfloat16)
    b_pad = jnp.zeros((1, Fp), jnp.float32).at[:, :F_].set(
        bias.astype(jnp.float32).reshape(1, F_))
    return w_pad, b_pad, F_


def pcnn_layer(x, mask, p1mask, p2mask, p3mask, w_slab, b_pad, num_filter, *, tile_b=8):
    """x: (B, L, D); masks: (B, L); w_slab/b_pad from prepare_pcnn_params."""
    B, L, D = x.shape
    three_d, Fp = w_slab.shape
    assert three_d == 3 * D

    # Batch tile: full batch if small, otherwise 8-row tiles (keeps the output
    # block's sublane dim 8-aligned and enables pipelining / megacore sharding).
    if B <= tile_b or B % tile_b != 0:
        TB = B
    else:
        TB = tile_b

    x = x.astype(jnp.float32)
    m3 = [m.reshape(B, L, 1).astype(jnp.float32) for m in (mask, p1mask, p2mask, p3mask)]

    out_padded = pl.pallas_call(
        pcnn_kernel,
        out_shape=jax.ShapeDtypeStruct((B, 3 * Fp), jnp.float32),
        grid=(B // TB,),
        in_specs=[
            pl.BlockSpec((TB, L, D), lambda b: (b, 0, 0)),
            pl.BlockSpec((TB, L, 1), lambda b: (b, 0, 0)),
            pl.BlockSpec((TB, L, 1), lambda b: (b, 0, 0)),
            pl.BlockSpec((TB, L, 1), lambda b: (b, 0, 0)),
            pl.BlockSpec((TB, L, 1), lambda b: (b, 0, 0)),
            pl.BlockSpec((3 * D, Fp), lambda b: (0, 0)),   # weights stay resident
            pl.BlockSpec((1, Fp), lambda b: (0, 0)),
        ],
        out_specs=pl.BlockSpec((TB, 3 * Fp), lambda b: (b, 0)),
        compiler_params=pltpu.CompilerParams(
            dimension_semantics=("parallel",),
            vmem_limit_bytes=48 * 1024 * 1024,   # fits the v7x 64 MiB budget too
        ),
    )(x, *m3, w_slab, b_pad)

    # Strip the lane padding and lay out as torch.cat((piece1, piece2, piece3), 1).
    out = out_padded.reshape(B, 3, Fp)[:, :, :num_filter].reshape(B, 3 * num_filter)
    return out


def reference(x, mask, p1, p2, p3, weight, bias):
    """Pure-JAX f32 reference mirroring the PyTorch forward (NCL conv path)."""
    xm = x * mask[:, :, None]
    xin = jnp.transpose(xm, (0, 2, 1))                       # (B, D, L)
    conv = jax.lax.conv_general_dilated(
        xin, weight, window_strides=(1,), padding=((1, 1),),
        dimension_numbers=("NCH", "OIH", "NCH"),
    ) + bias[None, :, None]                                  # (B, F, L)

    def piece(pm):
        keep = (pm != 0)[:, None, :]
        masked = jnp.where(keep, conv, -jnp.inf)
        return jnp.tanh(jnp.max(masked, axis=2))             # (B, F)

    return jnp.concatenate([piece(p1), piece(p2), piece(p3)], axis=1)


if __name__ == "__main__":
    B, L, D, F = 2, 16, 32, 16   # batch, seq, input_dim, num_filter

    key = jax.random.PRNGKey(0)
    kx, kw, kb = jax.random.split(key, 3)

    x = jax.random.normal(kx, (B, L, D), dtype=jnp.float32)

    # Conv1d-style init: U(-1/sqrt(fan_in), 1/sqrt(fan_in)), fan_in = D*3.
    bound = 1.0 / math.sqrt(D * 3)
    weight = jax.random.uniform(kw, (F, D, 3), jnp.float32, -bound, bound)
    bias = jax.random.uniform(kb, (F,), jnp.float32, -bound, bound)

    # Sequence mask and three non-overlapping piece masks (PCNN pieces).
    pos = jnp.arange(L)[None, :]
    valid_len = jnp.array([14, 12])[:, None]
    mask = (pos < valid_len).astype(jnp.float32)
    b1 = jnp.array([5, 4])[:, None]
    b2 = jnp.array([10, 9])[:, None]
    p1 = (pos < b1).astype(jnp.float32) * mask
    p2 = ((pos >= b1) & (pos < b2)).astype(jnp.float32) * mask
    p3 = (pos >= b2).astype(jnp.float32) * mask

    ref = reference(x, mask, p1, p2, p3, weight, bias)

    # Exact-math (f32 MXU) path: must match the reference tightly.
    w_f32, b_f32p, nf = prepare_pcnn_params(weight, bias, use_bf16=False)
    out_f32 = pcnn_layer(x, mask, p1, p2, p3, w_f32, b_f32p, nf)
    jax.block_until_ready(out_f32)
    assert out_f32.shape == (B, 3 * F)
    assert jnp.allclose(out_f32, ref, atol=1e-5, rtol=1e-5), "f32 path mismatch vs reference"

    # Optimized bf16-MXU path (f32 accumulation + f32 elementwise): looser tolerance.
    w_bf16, b_pad, nf = prepare_pcnn_params(weight, bias, use_bf16=True)
    out_bf16 = pcnn_layer(x, mask, p1, p2, p3, w_bf16, b_pad, nf)
    jax.block_until_ready(out_bf16)
    assert out_bf16.shape == (B, 3 * F)
    assert jnp.allclose(out_bf16, ref, atol=2e-2, rtol=2e-2), "bf16 path mismatch vs reference"

    print("KERNEL_OK")
</pallas_src>

<mosaic_0001>
module attributes {stable_mosaic.version = 11 : i64} {
  func.func @pcnn_kernel(%arg0: i32, %arg1: memref<2x16x32xf32, #tpu.memory_space<vmem>>, %arg2: memref<2x16x1xf32, #tpu.memory_space<vmem>>, %arg3: memref<2x16x1xf32, #tpu.memory_space<vmem>>, %arg4: memref<2x16x1xf32, #tpu.memory_space<vmem>>, %arg5: memref<2x16x1xf32, #tpu.memory_space<vmem>>, %arg6: memref<96x128xf32, #tpu.memory_space<vmem>>, %arg7: memref<1x128xf32, #tpu.memory_space<vmem>>, %arg8: memref<2x384xf32, #tpu.memory_space<vmem>>) attributes {dimension_semantics = [#tpu.dimension_semantics<parallel>], iteration_bounds = array<i64: 1>, scalar_prefetch = 0 : i64, scratch_operands = 0 : i64, tpu.core_type = #tpu.core_type<tc>, window_params = [{transform_indices = @transform_0, window_bounds = array<i64: 2, 16, 32>}, {transform_indices = @transform_1, window_bounds = array<i64: 2, 16, 1>}, {transform_indices = @transform_2, window_bounds = array<i64: 2, 16, 1>}, {transform_indices = @transform_3, window_bounds = array<i64: 2, 16, 1>}, {transform_indices = @transform_4, window_bounds = array<i64: 2, 16, 1>}, {pipeline_mode = #tpu.pipeline_mode<synchronous>, transform_indices = @transform_5, window_bounds = array<i64: 96, 128>}, {pipeline_mode = #tpu.pipeline_mode<synchronous>, transform_indices = @transform_6, window_bounds = array<i64: 1, 128>}, {transform_indices = @transform_7, window_bounds = array<i64: 2, 384>}]} {
    %c0 = arith.constant 0 : index
    %c0_0 = arith.constant 0 : index
    %c0_1 = arith.constant 0 : index
    %0 = vector.load %arg1[%c0, %c0_0, %c0_1] : memref<2x16x32xf32, #tpu.memory_space<vmem>>, vector<2x16x32xf32>
    %c0_2 = arith.constant 0 : index
    %c0_3 = arith.constant 0 : index
    %c0_4 = arith.constant 0 : index
    %1 = vector.load %arg2[%c0_2, %c0_3, %c0_4] : memref<2x16x1xf32, #tpu.memory_space<vmem>>, vector<2x16x1xf32>
    %2 = vector.broadcast %1 : vector<2x16x1xf32> to vector<2x16x32xf32>
    %3 = arith.mulf %0, %2 : vector<2x16x32xf32>
    %cst = arith.constant 0.000000e+00 : f32
    %4 = vector.broadcast %cst : f32 to vector<2x1x32xf32>
    %5 = vector.extract_strided_slice %3 {offsets = [0, 0, 0], sizes = [2, 15, 32], strides = [1, 1, 1]} : vector<2x16x32xf32> to vector<2x15x32xf32>
    %6 = tpu.concatenate %4, %5 in 1 : vector<2x1x32xf32>, vector<2x15x32xf32> -> vector<2x16x32xf32>
    %7 = vector.extract_strided_slice %3 {offsets = [0, 1, 0], sizes = [2, 15, 32], strides = [1, 1, 1]} : vector<2x16x32xf32> to vector<2x15x32xf32>
    %8 = tpu.concatenate %7, %4 in 1 : vector<2x15x32xf32>, vector<2x1x32xf32> -> vector<2x16x32xf32>
    %9 = tpu.concatenate %6, %3, %8 in 2 : vector<2x16x32xf32>, vector<2x16x32xf32>, vector<2x16x32xf32> -> vector<2x16x96xf32>
    %10 = vector.shape_cast %9 : vector<2x16x96xf32> to vector<32x96xf32>
    %c0_5 = arith.constant 0 : index
    %c0_6 = arith.constant 0 : index
    %11 = vector.load %arg6[%c0_5, %c0_6] : memref<96x128xf32, #tpu.memory_space<vmem>>, vector<96x128xf32>
    %cst_7 = arith.constant dense<0.000000e+00> : vector<32x128xf32>
    %12 = tpu.matmul %10, %11, %cst_7 {dimension_numbers = #tpu.dot_dimension_numbers<[1], [0], [0], [1], [0, 0, 1, 1], [], []>} : vector<32x96xf32>, vector<96x128xf32>, vector<32x128xf32> -> vector<32x128xf32>
    %13 = vector.shape_cast %12 : vector<32x128xf32> to vector<2x16x128xf32>
    %c0_8 = arith.constant 0 : index
    %c0_9 = arith.constant 0 : index
    %14 = vector.load %arg7[%c0_8, %c0_9] : memref<1x128xf32, #tpu.memory_space<vmem>>, vector<1x128xf32>
    %15 = vector.shape_cast %14 : vector<1x128xf32> to vector<1x1x128xf32>
    %16 = vector.broadcast %15 : vector<1x1x128xf32> to vector<2x16x128xf32>
    %17 = arith.addf %13, %16 : vector<2x16x128xf32>
    %c0_10 = arith.constant 0 : index
    %c0_11 = arith.constant 0 : index
    %c0_12 = arith.constant 0 : index
    %18 = vector.load %arg3[%c0_10, %c0_11, %c0_12] : memref<2x16x1xf32, #tpu.memory_space<vmem>>, vector<2x16x1xf32>
    %cst_13 = arith.constant 1.000000e+00 : f32
    %19 = vector.broadcast %cst_13 : f32 to vector<2x16x1xf32>
    %20 = arith.subf %19, %18 : vector<2x16x1xf32>
    %cst_14 = arith.constant -1.000000e+30 : f32
    %21 = vector.broadcast %cst_14 : f32 to vector<2x16x1xf32>
    %22 = arith.mulf %20, %21 : vector<2x16x1xf32>
    %23 = vector.broadcast %22 : vector<2x16x1xf32> to vector<2x16x128xf32>
    %24 = arith.addf %17, %23 : vector<2x16x128xf32>
    %cst_15 = arith.constant dense<0xFF800000> : vector<2x128xf32>
    %25 = vector.multi_reduction <maximumf>, %24, %cst_15 [1] : vector<2x16x128xf32> to vector<2x128xf32>
    %26 = math.tanh %25 : vector<2x128xf32>
    %c0_16 = arith.constant 0 : index
    %c0_17 = arith.constant 0 : index
    %27 = vector.load %arg8[%c0_16, %c0_17] : memref<2x384xf32, #tpu.memory_space<vmem>>, vector<2x128xf32>
    tpu.vector_store %arg8[%c0_16, %c0_17], %26 {strides = array<i32>} : memref<2x384xf32, #tpu.memory_space<vmem>>, vector<2x128xf32>,
    %c0_18 = arith.constant 0 : index
    %c0_19 = arith.constant 0 : index
    %c0_20 = arith.constant 0 : index
    %28 = vector.load %arg4[%c0_18, %c0_19, %c0_20] : memref<2x16x1xf32, #tpu.memory_space<vmem>>, vector<2x16x1xf32>
    %cst_21 = arith.constant 1.000000e+00 : f32
    %29 = vector.broadcast %cst_21 : f32 to vector<2x16x1xf32>
    %30 = arith.subf %29, %28 : vector<2x16x1xf32>
    %cst_22 = arith.constant -1.000000e+30 : f32
    %31 = vector.broadcast %cst_22 : f32 to vector<2x16x1xf32>
    %32 = arith.mulf %30, %31 : vector<2x16x1xf32>
    %33 = vector.broadcast %32 : vector<2x16x1xf32> to vector<2x16x128xf32>
    %34 = arith.addf %17, %33 : vector<2x16x128xf32>
    %cst_23 = arith.constant dense<0xFF800000> : vector<2x128xf32>
    %35 = vector.multi_reduction <maximumf>, %34, %cst_23 [1] : vector<2x16x128xf32> to vector<2x128xf32>
    %36 = math.tanh %35 : vector<2x128xf32>
    %c0_24 = arith.constant 0 : index
    %c128 = arith.constant 128 : index
    %37 = vector.load %arg8[%c0_24, %c128] : memref<2x384xf32, #tpu.memory_space<vmem>>, vector<2x128xf32>
    tpu.vector_store %arg8[%c0_24, %c128], %36 {strides = array<i32>} : memref<2x384xf32, #tpu.memory_space<vmem>>, vector<2x128xf32>,
    %c0_25 = arith.constant 0 : index
    %c0_26 = arith.constant 0 : index
    %c0_27 = arith.constant 0 : index
    %38 = vector.load %arg5[%c0_25, %c0_26, %c0_27] : memref<2x16x1xf32, #tpu.memory_space<vmem>>, vector<2x16x1xf32>
    %cst_28 = arith.constant 1.000000e+00 : f32
    %39 = vector.broadcast %cst_28 : f32 to vector<2x16x1xf32>
    %40 = arith.subf %39, %38 : vector<2x16x1xf32>
    %cst_29 = arith.constant -1.000000e+30 : f32
    %41 = vector.broadcast %cst_29 : f32 to vector<2x16x1xf32>
    %42 = arith.mulf %40, %41 : vector<2x16x1xf32>
    %43 = vector.broadcast %42 : vector<2x16x1xf32> to vector<2x16x128xf32>
    %44 = arith.addf %17, %43 : vector<2x16x128xf32>
    %cst_30 = arith.constant dense<0xFF800000> : vector<2x128xf32>
    %45 = vector.multi_reduction <maximumf>, %44, %cst_30 [1] : vector<2x16x128xf32> to vector<2x128xf32>
    %46 = math.tanh %45 : vector<2x128xf32>
    %c0_31 = arith.constant 0 : index
    %c256 = arith.constant 256 : index
    %47 = vector.load %arg8[%c0_31, %c256] : memref<2x384xf32, #tpu.memory_space<vmem>>, vector<2x128xf32>
    tpu.vector_store %arg8[%c0_31, %c256], %46 {strides = array<i32>} : memref<2x384xf32, #tpu.memory_space<vmem>>, vector<2x128xf32>,
    return
  }
  func.func @transform_0(%arg0: i32) -> (i32, i32, i32) {
    %c0_i32 = arith.constant 0 : i32
    %c0_i32_0 = arith.constant 0 : i32
    %c0_i32_1 = arith.constant 0 : i32
    return %arg0, %c0_i32, %c0_i32_0 : i32, i32, i32
  }
  func.func @transform_1(%arg0: i32) -> (i32, i32, i32) {
    %c0_i32 = arith.constant 0 : i32
    %c0_i32_0 = arith.constant 0 : i32
    %c0_i32_1 = arith.constant 0 : i32
    return %arg0, %c0_i32, %c0_i32_0 : i32, i32, i32
  }
  func.func @transform_2(%arg0: i32) -> (i32, i32, i32) {
    %c0_i32 = arith.constant 0 : i32
    %c0_i32_0 = arith.constant 0 : i32
    %c0_i32_1 = arith.constant 0 : i32
    return %arg0, %c0_i32, %c0_i32_0 : i32, i32, i32
  }
  func.func @transform_3(%arg0: i32) -> (i32, i32, i32) {
    %c0_i32 = arith.constant 0 : i32
    %c0_i32_0 = arith.constant 0 : i32
    %c0_i32_1 = arith.constant 0 : i32
    return %arg0, %c0_i32, %c0_i32_0 : i32, i32, i32
  }
  func.func @transform_4(%arg0: i32) -> (i32, i32, i32) {
    %c0_i32 = arith.constant 0 : i32
    %c0_i32_0 = arith.constant 0 : i32
    %c0_i32_1 = arith.constant 0 : i32
    return %arg0, %c0_i32, %c0_i32_0 : i32, i32, i32
  }
  func.func @transform_5(%arg0: i32) -> (i32, i32) {
    %c0_i32 = arith.constant 0 : i32
    %c0_i32_0 = arith.constant 0 : i32
    %c0_i32_1 = arith.constant 0 : i32
    return %c0_i32, %c0_i32_0 : i32, i32
  }
  func.func @transform_6(%arg0: i32) -> (i32, i32) {
    %c0_i32 = arith.constant 0 : i32
    %c0_i32_0 = arith.constant 0 : i32
    %c0_i32_1 = arith.constant 0 : i32
    return %c0_i32, %c0_i32_0 : i32, i32
  }
  func.func @transform_7(%arg0: i32) -> (i32, i32) {
    %c0_i32 = arith.constant 0 : i32
    %c0_i32_0 = arith.constant 0 : i32
    return %arg0, %c0_i32 : i32, i32
  }
}

</mosaic_0001>

<bundles_post_ra>
// kernel: tpu_custom_call.1
= control target key start
LH: loop header
LB: loop body
LE: loop exit
PB: predicated region body
PF: predicated region fallthrough
CT: control target
= control target key end

     0   :  { %v625_v2 = vmov 0   ;;  %s837_s0 = inlined_call_operand.vmem [shape: f32[2,16,32], index: 0, kind: input, shape index: {}]   ;;  %s838_s1 = inlined_call_operand.vmem [shape: f32[2,16,1], index: 1, kind: input, shape index: {}]   ;;  %s839_s2 = inlined_call_operand.vmem [shape: f32[2,16,1], index: 2, kind: input, shape index: {}]   ;;  %s840_s3 = inlined_call_operand.vmem [shape: f32[2,16,1], index: 3, kind: input, shape index: {}]   ;;  %s841_s4 = inlined_call_operand.vmem [shape: f32[2,16,1], index: 4, kind: input, shape index: {}]   ;;  %s842_s5 = inlined_call_operand.vmem [shape: f32[96,128], index: 5, kind: input, shape index: {}]   ;;  %s843_s6 = inlined_call_operand.vmem [shape: f32[1,128], index: 6, kind: input, shape index: {}]   ;;  %s844_s7 = inlined_call_operand.hbm [shape: f32[2,384], index: 7, kind: output, shape index: {}]  }
   0x1   :  { %v33_v0 = vld [vmem:[%s838_s1 + $0x10] sm:$0xff]  ;;  %v31_v1 = vld [vmem:[%s838_s1] sm:$0xff]  ;;  %587 = vset.pattern.permute.xlu0 %v625_v2  ;;  %588 = vset.pattern.permute.xlu1 %v625_v2 }
   0x2   :  { %12 = vsyncpa [#allocation3], 0  ;;  %47 = vperm.xlu0 %587, %v33_v0   ;;  %37 = vperm.xlu1 %588, %v31_v1   ;;  %v34_v3 = vld [vmem:[%s838_s1 + $0x18] sm:$0xff]  ;;  %v32_v4 = vld [vmem:[%s838_s1 + $0x8] sm:$0xff]  ;;  %s626_s16 = smov 32   ;;  %vm76_vm0 = vcmask 1046528  }
   0x3   :  { %v123_v5 = vld [vmem:[%s842_s5] sm:$0xff]  ;;  %v124_v6 = vld [vmem:[%s842_s5 + $0x8] sm:$0xff]  ;;  %v125_v7 = vld [vmem:[%s842_s5 + $0x10] sm:$0xff]  ;;  %vm63_vm1 = vcmask 1040384   ;;  %vm113_vm2 = vcmask 261120   ;;  %vm118_vm3 = vcmask 523264  }
   0x4   :  { %v546_v8 = vpack.c.bf16 %v124_v6, %v123_v5  ;;  %v126_v9 = vld [vmem:[%s842_s5 + $0x18] sm:$0xff]  ;;  %v127_v11 = vld [vmem:[%s842_s5 + $0x20] sm:$0xff]  ;;  %v128_v12 = vld [vmem:[%s842_s5 + $0x28] sm:$0xff]  ;;  %vm135_vm4 = vcmask 785408   ;;  %vm317_vm5 = vcmask 1041409   ;;  %vm319_vm6 = vcmask 1043459  }
   0x5   :  { %v550_v10 = vpack.c.bf16 %v126_v9, %v125_v7  ;;  %v554_v13 = vpack.c.bf16 %v128_v12, %v127_v11  ;;  %v129_v14 = vld [vmem:[%s842_s5 + $0x30] sm:$0xff]  ;;  %v130_v15 = vld [vmem:[%s842_s5 + $0x38] sm:$0xff]  ;;  %v131_v17 = vld [vmem:[%s842_s5 + $0x40] sm:$0xff]  ;;  %vm321_vm7 = vcmask 1045509   ;;  %vm323_vm8 = vcmask 1047559  }
   0x6   :  { %52 = vperm.xlu0 %587, %v34_v3   ;;  %42 = vperm.xlu1 %588, %v32_v4   ;;  %v558_v16 = vpack.c.bf16 %v130_v15, %v129_v14  ;;  %v132_v18 = vld [vmem:[%s842_s5 + $0x48] sm:$0xff]  ;;  %v133_v20 = vld [vmem:[%s842_s5 + $0x50] sm:$0xff]  ;;  %v134_v21 = vld [vmem:[%s842_s5 + $0x58] sm:$0xff] }
   0x7   :  { %570 = vmatprep.subr.bf16.mxu1 %v546_v8  ;;  %547 = vmatprep.subr.bf16.mxu0 %v546_v8  ;;  %v562_v19 = vpack.c.bf16 %v132_v18, %v131_v17  ;;  %v566_v22 = vpack.c.bf16 %v134_v21, %v133_v20  ;;  %v29_v23 = vld [vmem:[%s837_s0 + $0x10] sm:$0xff]  ;;  %v27_v24 = vld [vmem:[%s837_s0] sm:$0xff]  ;;  %v30_v28 = vld [vmem:[%s837_s0 + $0x18] sm:$0xff] }
   0x8   :  { %576 = vmatpush3.bf16.msra.mxu1 %v546_v8  ;;  %549 = vmatpush3.bf16.msra.mxu0 %v546_v8  ;;  %v28_v30 = vld [vmem:[%s837_s0 + $0x8] sm:$0xff]  ;;  %s627_s0 = smov 64   ;;  %v246_v44 = vld [vmem:[%s839_s2 + $0x10] sm:$0xff]  ;;  %v247_v45 = vld [vmem:[%s839_s2 + $0x18] sm:$0xff] }
   0x9   :  { %571 = vmatprep.subr.bf16.mxu1 %v550_v10  ;;  %551 = vmatprep.subr.bf16.mxu0 %v550_v10  ;;  %v250_v49 = vsub.f32 1.0, %v246_v44  ;;  %v251_v50 = vsub.f32 1.0, %v247_v45  ;;  %v329_v51 = vld [vmem:[%s840_s3 + $0x10] sm:$0xff]  ;;  %v330_v52 = vld [vmem:[%s840_s3 + $0x18] sm:$0xff]  ;;  %v244_v1 = vld [vmem:[%s839_s2] sm:$0xff] }
   0xa   :  { %v333_v56 = vsub.f32 1.0, %v329_v51  ;;  %v334_v58 = vsub.f32 1.0, %v330_v52  ;;  %v406_v59 = vld [vmem:[%s841_s4 + $0x10] sm:$0xff]  ;;  %v407_v60 = vld [vmem:[%s841_s4 + $0x18] sm:$0xff]  ;;  %v245_v2 = vld [vmem:[%s839_s2 + $0x8] sm:$0xff]  ;;  %v248_v4 = vsub.f32 1.0, %v244_v1 }
   0xb   :  { %v254_v55 = vmul.f32 -1e+30, %v250_v49  ;;  %v255_v57 = vmul.f32 -1e+30, %v251_v50  ;;  %v410_v62 = vsub.f32 1.0, %v406_v59  ;;  %v411_v0 = vsub.f32 1.0, %v407_v60 }
   0xc   :  { %577 = vmatpush3.bf16.msra.mxu1 %v550_v10  ;;  %553 = vmatpush3.bf16.msra.mxu0 %v550_v10  ;;  %v337_v61 = vmul.f32 -1e+30, %v333_v56  ;;  %v338_v63 = vmul.f32 -1e+30, %v334_v58  ;;  %v249_v6 = vsub.f32 1.0, %v245_v2  ;;  %v327_v7 = vld [vmem:[%s840_s3] sm:$0xff] }
   0xd   :  { %572 = vmatprep.subr.bf16.mxu1 %v554_v13  ;;  %555 = vmatprep.subr.bf16.mxu0 %v554_v13  ;;  %v414_v3 = vmul.f32 -1e+30, %v410_v62  ;;  %v415_v5 = vmul.f32 -1e+30, %v411_v0  ;;  %v328_v8 = vld [vmem:[%s840_s3 + $0x8] sm:$0xff]  ;;  %v331_v10 = vsub.f32 1.0, %v327_v7 }
   0xe   :  { %v252_v9 = vmul.f32 -1e+30, %v248_v4  ;;  %v253_v11 = vmul.f32 -1e+30, %v249_v6  ;;  %v332_v12 = vsub.f32 1.0, %v328_v8  ;;  %v405_v14 = vld [vmem:[%s841_s4 + $0x8] sm:$0xff] }
   0xf   :  { %v335_v15 = vmul.f32 -1e+30, %v331_v10  ;;  %v409_v18 = vsub.f32 1.0, %v405_v14 }
  0x10   :  { %578 = vmatpush3.bf16.msra.mxu1 %v554_v13  ;;  %557 = vmatpush3.bf16.msra.mxu0 %v554_v13  ;;  %v404_v13 = vld [vmem:[%s841_s4] sm:$0xff]  ;;  %v336_v17 = vmul.f32 -1e+30, %v332_v12 }
  0x11   :  { %573 = vmatprep.subr.bf16.mxu1 %v558_v16  ;;  %559 = vmatprep.subr.bf16.mxu0 %v558_v16  ;;  %v413_v20 = vmul.f32 -1e+30, %v409_v18 }
  0x14   :  { %579 = vmatpush3.bf16.msra.mxu1 %v558_v16  ;;  %561 = vmatpush3.bf16.msra.mxu0 %v558_v16  ;;  %v408_v16 = vsub.f32 1.0, %v404_v13 }
  0x15   :  { %574 = vmatprep.subr.bf16.mxu1 %v562_v19  ;;  %563 = vmatprep.subr.bf16.mxu0 %v562_v19 }
  0x18   :  { %580 = vmatpush3.bf16.msra.mxu1 %v562_v19  ;;  %565 = vmatpush3.bf16.msra.mxu0 %v562_v19  ;;  %v412_v19 = vmul.f32 -1e+30, %v408_v16 }
  0x19   :  { %575 = vmatprep.subr.bf16.mxu1 %v566_v22  ;;  %567 = vmatprep.subr.bf16.mxu0 %v566_v22 }
  0x1c   :  { %581 = vmatpush3.bf16.msra.mxu1 %v566_v22  ;;  %569 = vmatpush3.bf16.msra.mxu0 %v566_v22 }
  0x81   :  { %v48_v25 = vpop.permute.xlu0 %47  ;;  %v38_v26 = vpop.permute.xlu1 %37 }
  0x82   :  { %v724_v27 = vmul.f32 %v48_v25, %v29_v23  ;;  %v729_v29 = vmul.f32 %v38_v26, %v27_v24 }
  0x84   :  { %91 = vrot.lane.b32.xlu0 %v724_v27, %s626_s16  ;;  %v64_v35 = vrot.slane %v729_v29, 7  ;;  %v80_v36 = vrot.slane %v724_v27, 1  ;;  %v67_v40 = vrot.slane %v724_v27, 7  ;;  %v77_v46 = vrot.slane %v729_v29, 1 }
  0x85   :  { %v53_v31 = vpop.permute.xlu0 %52  ;;  %v43_v32 = vpop.permute.xlu1 %42 }
  0x86   :  { %v58_v33 = vmul.f32 %v53_v31, %v30_v28  ;;  %v56_v34 = vmul.f32 %v43_v32, %v28_v30  ;;  %v75_v23 = vsel %vm63_vm1, 0.0, %v67_v40  ;;  %v74_v27 = vsel %vm63_vm1, 0.0, %v64_v35 }
  0x88   :  { %v68_v37 = vrot.slane %v58_v33, 7  ;;  %v81_v38 = vrot.slane %v58_v33, 1  ;;  %93 = vrot.lane.b32.xlu1 %v58_v33, %s626_s16  ;;  %v65_v39 = vrot.slane %v56_v34, 7  ;;  %v78_v47 = vrot.slane %v56_v34, 1 }
  0x8a   :  { %v82_v41 = vsel %vm76_vm0, %v80_v36, %v81_v38  ;;  %v742_v42 = vsel %vm63_vm1, %v67_v40, %v68_v37  ;;  %v747_v43 = vsel %vm63_vm1, %v64_v35, %v65_v39  ;;  %v86_v48 = vsel %vm76_vm0, %v81_v38, 0.0 }
  0x8b   :  { %105 = vrot.lane.b32.xlu0 %v82_v41, %s627_s0  ;;  %v79_v53 = vsel %vm76_vm0, %v77_v46, %v78_v47  ;;  %v85_v54 = vsel %vm76_vm0, %v78_v47, 0.0 }
  0x8c   :  { %87 = vrot.lane.b32.xlu1 %v729_v29, %s626_s16 }
  0x8f   :  { %107 = vrot.lane.b32.xlu0 %v86_v48, %s627_s0 }
  0x90   :  { %89 = vrot.lane.b32.xlu1 %v56_v34, %s626_s16 }
  0x93   :  { %101 = vrot.lane.b32.xlu0 %v79_v53, %s627_s0 }
  0x94   :  { %103 = vrot.lane.b32.xlu1 %v85_v54, %s627_s0 }
  0x97   :  { %268 = vperm.xlu0 %587, %v254_v55  }
  0x98   :  { %273 = vperm.xlu1 %588, %v255_v57  }
  0x9b   :  { %351 = vperm.xlu0 %587, %v337_v61  }
  0x9c   :  { %356 = vperm.xlu1 %588, %v338_v63  }
  0x9f   :  { %428 = vperm.xlu0 %587, %v414_v3  }
  0xa0   :  { %433 = vperm.xlu1 %588, %v415_v5  }
  0xa3   :  { %258 = vperm.xlu0 %587, %v252_v9  }
  0xa4   :  { %263 = vperm.xlu1 %588, %v253_v11  }
  0xa7   :  { %341 = vperm.xlu0 %587, %v335_v15  }
  0xa8   :  { %346 = vperm.xlu1 %588, %v336_v17  }
  0xab   :  { %418 = vperm.xlu0 %587, %v412_v19  }
  0xac   :  { %423 = vperm.xlu1 %588, %v413_v20  }
  0xf6   :  { %v92_v21 = vpop.permute.xlu0 %91 }
  0xf7   :  { %v116_v24 = vsel %vm113_vm2, %v75_v23, %v92_v21 }
  0xfa   :  { %v94_v22 = vpop.permute.xlu1 %93 }
  0xfb   :  { %v117_v30 = vsel %vm113_vm2, %v742_v42, %v94_v22 }
  0xfd   :  { %v106_v25 = vpop.permute.xlu0 %105 }
  0xfe   :  { %v88_v26 = vpop.permute.xlu1 %87  ;;  %v121_v28 = vsel %vm118_vm3, %v116_v24, %v106_v25 }
  0xff   :  { %543 = vmatprep.mubr.msk.f32.mxu1 %vm135_vm4, %v121_v28  ;;  %v114_v34 = vsel %vm113_vm2, %v74_v27, %v88_v26 }
 0x101   :  { %v108_v31 = vpop.permute.xlu0 %107 }
 0x102   :  { %v122_v32 = vsel %vm118_vm3, %v117_v30, %v108_v31  ;;  %v90_v33 = vpop.permute.xlu1 %89 }
 0x103   :  { %544 = vmatmul.mubr.msk.f32.vlgmr.msra.gmra.mrb[0].mxu1 %vm135_vm4, %v122_v32  ;;  %v115_v37 = vsel %vm113_vm2, %v747_v43, %v90_v33  ;;  %v499_v43 = vld [vmem:[%s843_s6] ss:$0 sm:$0xff]  ;;  %s629_s6 = smov [#allocation2]  }
 0x104   :  { %s487_s15 = sshll.u32 %s629_s6, 4  ;;  %s488_s15 = int_to_ptr.vmem [resolvable:$true] %s487_s15 }
 0x105   :  { %v102_v36 = vpop.permute.xlu0 %101  ;;  %s601_s16 = scalar_lea.vmem %s488_s15, 96  ;;  %p606_p1 = scmp.lt.s32.totalorder %s488_s15, %s488_s15 }
 0x106   :  { %v104_v38 = vpop.permute.xlu1 %103  ;;  %v119_v39 = vsel %vm118_vm3, %v114_v34, %v102_v36  ;;  %p602_p0 = scmp.ne.s32.totalorder %s488_s15, %s601_s16  ;;  %p607_p2 = scmp.lt.s32.totalorder %s601_s16, %s601_s16 }
 0x107   :  { %v120_v40 = vsel %vm118_vm3, %v115_v37, %v104_v38  ;;  %540 = vmatprep.mubr.msk.f32.mxu0 %vm135_vm4, %v119_v39 }
 0x108   :  { %541 = vmatmul.mubr.msk.f32.vlgmr.msra.gmra.mrb[0].mxu0 %vm135_vm4, %v120_v40  ;;  %p608_p3 = por %p607_p2, %p606_p1 }
 0x10a   :  { %p609_p4 = pnand %p608_p3, %p602_p0 }
 0x116   :  { %v269_v42 = vpop.permute.xlu0 %268 }
 0x117   :  { %v274_v41 = vpop.permute.xlu1 %273 }
 0x11a   :  { %v352_v44 = vpop.permute.xlu0 %351 }
 0x11b   :  { %v357_v29 = vpop.permute.xlu1 %356 }
 0x11e   :  { %v429_v45 = vpop.permute.xlu0 %428 }
 0x11f   :  { %v434_v35 = vpop.permute.xlu1 %433 }
 0x122   :  { %v259_v47 = vpop.permute.xlu0 %258 }
 0x123   :  { %v264_v46 = vpop.permute.xlu1 %263 }
 0x126   :  { %v342_v53 = vpop.permute.xlu0 %341 }
 0x127   :  { %v347_v51 = vpop.permute.xlu1 %346 }
 0x12a   :  { %v419_v8 = vpop.permute.xlu0 %418 }
 0x12b   :  { %v424_v3 = vpop.permute.xlu1 %423 }
 0x1d6   :  { %v545_v48 = vpop.f32.mrb[0].mxu1 }
 0x1d7   :  { %v243_v49 = vadd.f32 %v545_v48, %v499_v43  ;;  %v224_v50 = vpop.f32.mrb[1].mxu1 }
 0x1d8   :  { %v242_v52 = vadd.f32 %v499_v43, %v224_v50 }
 0x1d9   :  { %v279_v54 = vadd.f32 %v274_v41, %v243_v49  ;;  %v362_v55 = vadd.f32 %v357_v29, %v243_v49  ;;  %v439_v56 = vadd.f32 %v434_v35, %v243_v49 }
 0x1da   :  { %v278_v57 = vadd.f32 %v269_v42, %v242_v52  ;;  %v361_v58 = vadd.f32 %v352_v44, %v242_v52  ;;  %v438_v59 = vadd.f32 %v429_v45, %v242_v52  ;;  %v628_v45 = vmov 1983009808  }
 0x1db   :  { %v542_v60 = vpop.f32.mrb[0].mxu0 }
 0x1dc   :  { %v287_v61 = vmax.f32 %v278_v57, %v279_v54  ;;  %v370_v62 = vmax.f32 %v361_v58, %v362_v55  ;;  %v447_v63 = vmax.f32 %v438_v59, %v439_v56  ;;  %v241_v0 = vadd.f32 %v542_v60, %v499_v43  ;;  %v214_v1 = vpop.f32.mrb[1].mxu0 }
 0x1dd   :  { %v240_v2 = vadd.f32 %v499_v43, %v214_v1 }
 0x1de   :  { %v288_v4 = vrot.slane %v287_v61, 4  ;;  %v371_v5 = vrot.slane %v370_v62, 4  ;;  %v448_v6 = vrot.slane %v447_v63, 4  ;;  %v277_v7 = vadd.f32 %v264_v46, %v241_v0 }
 0x1df   :  { %v360_v9 = vadd.f32 %v347_v51, %v241_v0  ;;  %v437_v10 = vadd.f32 %v424_v3, %v241_v0  ;;  %v276_v11 = vadd.f32 %v259_v47, %v240_v2  ;;  %v359_v12 = vadd.f32 %v342_v53, %v240_v2 }
 0x1e0   :  { %v289_v13 = vmax.f32 %v287_v61, %v288_v4  ;;  %v372_v14 = vmax.f32 %v370_v62, %v371_v5  ;;  %v449_v15 = vmax.f32 %v447_v63, %v448_v6  ;;  %v436_v16 = vadd.f32 %v419_v8, %v240_v2 }
 0x1e1   :  { %v280_v17 = vmax.f32 %v276_v11, %v277_v7  ;;  %v363_v18 = vmax.f32 %v359_v12, %v360_v9  ;;  %v299_v46 = vunpack.c.l.s4 %v628_v45  ;;  %v301_v47 = vlaneseq }
 0x1e2   :  { %v290_v19 = vrot.slane %v289_v13, 2  ;;  %v373_v20 = vrot.slane %v372_v14, 2  ;;  %v450_v21 = vrot.slane %v449_v15, 2  ;;  %v440_v22 = vmax.f32 %v436_v16, %v437_v10 }
 0x1e3   :  { %v281_v23 = vrot.slane %v280_v17, 4  ;;  %v364_v24 = vrot.slane %v363_v18, 4  ;;  %v300_v53 = vunpack.c.0.s8 %v299_v46  ;;  %v302_v54 = vshrl.u32 %v301_v47, 7 }
 0x1e4   :  { %v291_v25 = vmax.f32 %v289_v13, %v290_v19  ;;  %v374_v26 = vmax.f32 %v372_v14, %v373_v20  ;;  %v451_v28 = vmax.f32 %v449_v15, %v450_v21  ;;  %v441_v30 = vrot.slane %v440_v22, 4 }
 0x1e5   :  { %v282_v31 = vmax.f32 %v280_v17, %v281_v23  ;;  %v365_v32 = vmax.f32 %v363_v18, %v364_v24  ;;  %v303_v55 = vsub.s32 %v300_v53, %v302_v54 }
 0x1e6   :  { %v292_v33 = vrot.slane %v291_v25, 1  ;;  %v375_v27 = vrot.slane %v374_v26, 1  ;;  %v452_v34 = vrot.slane %v451_v28, 1  ;;  %v442_v36 = vmax.f32 %v440_v22, %v441_v30 }
 0x1e7   :  { %v283_v37 = vrot.slane %v282_v31, 2  ;;  %v366_v38 = vrot.slane %v365_v32, 2 }
 0x1e8   :  { %v293_v39 = vmax.f32 %v291_v25, %v292_v33  ;;  %v376_v40 = vmax.f32 %v374_v26, %v375_v27  ;;  %v453_v41 = vmax.f32 %v451_v28, %v452_v34  ;;  %v443_v42 = vrot.slane %v442_v36, 2 }
 0x1e9   :  { %v284_v29 = vmax.f32 %v282_v31, %v283_v37  ;;  %v367_v44 = vmax.f32 %v365_v32, %v366_v38 }
 0x1ea   :  { %589 = vtanh.f32 %v293_v39  ;;  %v444_v35 = vmax.f32 %v442_v36, %v443_v42 }
 0x1eb   :  { %591 = vtanh.f32 %v376_v40  ;;  %v285_v43 = vrot.slane %v284_v29, 1  ;;  %v368_v48 = vrot.slane %v367_v44, 1 }
 0x1ec   :  { %593 = vtanh.f32 %v453_v41  ;;  %v445_v49 = vrot.slane %v444_v35, 1 }
 0x1ed   :  { %v286_v50 = vmax.f32 %v284_v29, %v285_v43  ;;  %v369_v51 = vmax.f32 %v367_v44, %v368_v48 }
 0x1ee   :  { %v446_v52 = vmax.f32 %v444_v35, %v445_v49 }
 0x1ef   :  { %595 = vtanh.f32 %v286_v50 }
 0x1f0   :  { %597 = vtanh.f32 %v369_v51 }
 0x1f1   :  { %599 = vtanh.f32 %v446_v52 }
 0x1f4   :  { %v590_v56 = vpop.eup %589 }
 0x1f5   :  { %v592_v57 = vpop.eup %591  ;;  %v311_v59 = vrot.slane %v590_v56, %v303_v55 }
 0x1f6   :  { %v594_v58 = vpop.eup %593  ;;  %v394_v60 = vrot.slane %v592_v57, %v303_v55 }
 0x1f7   :  { %v471_v61 = vrot.slane %v594_v58, %v303_v55  ;;  %v316_v1 = vrot.slane %v311_v59, 7 }
 0x1f8   :  { %v397_v4 = vrot.slane %v394_v60, 7 }
 0x1f9   :  { %v596_v62 = vpop.eup %595  ;;  %v474_v7 = vrot.slane %v471_v61, 7 }
 0x1fa   :  { %v598_v63 = vpop.eup %597  ;;  %v304_v0 = vrot.slane %v596_v62, %v303_v55 }
 0x1fb   :  { %v600_v2 = vpop.eup %599  ;;  %v387_v3 = vrot.slane %v598_v63, %v303_v55 }
 0x1fc   :  { %v318_v5 = vsel %vm317_vm5, %v316_v1, %v304_v0  ;;  %v464_v6 = vrot.slane %v600_v2, %v303_v55 }
 0x1fd   :  { %v320_v8 = vsel %vm319_vm6, %v316_v1, %v318_v5  ;;  %v398_v9 = vsel %vm317_vm5, %v397_v4, %v387_v3 }
 0x1fe   :  { %v322_v10 = vsel %vm321_vm7, %v316_v1, %v320_v8  ;;  %v399_v11 = vsel %vm319_vm6, %v397_v4, %v398_v9  ;;  %v475_v12 = vsel %vm317_vm5, %v474_v7, %v464_v6 }
 0x1ff   :  { %v324_v13 = vsel %vm323_vm8, %v316_v1, %v322_v10  ;;  %v400_v14 = vsel %vm321_vm7, %v397_v4, %v399_v11  ;;  %v476_v15 = vsel %vm319_vm6, %v474_v7, %v475_v12 }
 0x200   :  { %326 = vst [vmem:[#allocation2] sm:$0x3] %v324_v13  ;;  %v401_v16 = vsel %vm323_vm8, %v397_v4, %v400_v14  ;;  %v477_v17 = vsel %vm321_vm7, %v474_v7, %v476_v15 }
 0x201   :  { %403 = vst [vmem:[#allocation2 + $0x2] sm:$0x3] %v401_v16  ;;  %v478_v18 = vsel %vm323_vm8, %v474_v7, %v477_v17 }
 0x202   :  { %480 = vst [vmem:[#allocation2 + $0x4] sm:$0x3] %v478_v18 }
 0x203   :  { %612 = shalt.err (!%p609_p4)
}
 0x204   :  { %s613_s17 = scalar_lea.hbm %s844_s7, 96 }
 0x205   :  { %p614_p5 = scmp.ne.s32.totalorder %s844_s7, %s613_s17  ;;  %p617_p6 = scmp.lt.u32.totalorder %s613_s17, %s844_s7 }
 0x207   :  { %p619_p7 = pnand %p617_p6, %p614_p5 }
 0x209   :  { %622 = shalt.err (!%p619_p7)
}
 0x20a   :  { %490 = dma.vmem_to_hbm [thread:$0]  %s488_s15, 96, %s844_s7, [#allocation3]  }
 0x20b   :  { %623 = dma.done.wait [#allocation3], 96  }
 0x20c   :  { %624 = vsyncadd [#allocation3], 4294967200 }
 0x20d   :  { %494 = vsyncpa [#allocation3], 1 }

</bundles_post_ra>
